<compile_context>
chip_gen: v7x
topology: tpu7x:2x2x1
jax: 0.10.0
libtpu: 0.0.40
codegen_flags: <defaults>
</compile_context>

<pallas_src>
import functools

import jax
import jax.numpy as jnp
from jax.experimental import pallas as pl
from jax.experimental.pallas import tpu as pltpu

EPS = 1e-08


def _cdiv(a, b):
    return -(-a // b)


def _vmem_capacity_bytes():
    """Physical per-core VMEM, with a conservative fallback."""
    try:
        info = pltpu.get_tpu_info()
        cap = getattr(info, "vmem_capacity_bytes", None)
        if cap:
            return int(cap)
    except Exception:
        pass
    return 64 * 1024 * 1024  # v7x-sized fallback (safe everywhere)


def _budgets():
    """(block_budget_bytes, vmem_limit_bytes, two_tensorcores)."""
    cap = _vmem_capacity_bytes()
    if cap >= 96 * 1024 * 1024:
        # 128 MiB parts (v5e / v6e): single TensorCore, use most of VMEM.
        return 80 * 1024 * 1024, 104 * 1024 * 1024, False
    # 64 MiB parts (v7x): two TensorCores per chip; keep headroom.
    return 40 * 1024 * 1024, 48 * 1024 * 1024, True


# ----------------------------------------------------------------------------
# Fused single-pass kernel: whole (N, K) slab of several batch elements.
# ----------------------------------------------------------------------------
def _gln_fused_kernel(y_ref, gamma_ref, beta_ref, out_ref, *, inv_count):
    # y_ref: (TB, N, K), gamma/beta: (1, N, 1), out_ref: (TB, N, K)
    y = y_ref[...].astype(jnp.float32)

    # Single traversal: fused sum and sum-of-squares per batch element.
    s = jnp.sum(y, axis=(1, 2), keepdims=True)          # (TB, 1, 1)
    ss = jnp.sum(y * y, axis=(1, 2), keepdims=True)     # (TB, 1, 1)
    mean = s * inv_count
    var = jnp.maximum(ss * inv_count - mean * mean, 0.0)
    inv_std = jax.lax.rsqrt(var + EPS)                  # EUP transcendental

    gamma = gamma_ref[...].astype(jnp.float32)          # (1, N, 1)
    beta = beta_ref[...].astype(jnp.float32)

    # Fold the affine: one mul + one add at full (N, K) size.
    scale = gamma * inv_std                             # (TB, N, 1)
    shift = beta - mean * scale                         # (TB, N, 1)

    # Re-read y for the normalize so the casted block need not stay live
    # across the reductions (avoids a resident full-size f32 temporary).
    out_ref[...] = (y_ref[...].astype(jnp.float32) * scale + shift).astype(
        out_ref.dtype)


# ----------------------------------------------------------------------------
# Two-pass path (single sample too large for VMEM): reduce then normalize.
# ----------------------------------------------------------------------------
def _gln_stats_kernel(y_ref, s_ref, ss_ref, *, k_tile, true_k):
    # y_ref: (1, N, k_tile); s_ref/ss_ref: (1, 1, 1) accumulators (per batch).
    k = pl.program_id(1)

    @pl.when(k == 0)
    def _():
        s_ref[...] = jnp.zeros_like(s_ref)
        ss_ref[...] = jnp.zeros_like(ss_ref)

    # Mask the out-of-range tail of the last (partial) K tile so OOB garbage
    # never pollutes the sums (jnp.where so NaN/Inf garbage cannot propagate).
    col = jax.lax.broadcasted_iota(jnp.int32, y_ref.shape, 2) + k * k_tile
    y = jnp.where(col < true_k, y_ref[...].astype(jnp.float32), 0.0)

    s_ref[...] += jnp.sum(y, axis=(1, 2), keepdims=True)
    ss_ref[...] += jnp.sum(y * y, axis=(1, 2), keepdims=True)


def _gln_norm_kernel(y_ref, scale_ref, shift_ref, out_ref):
    # y_ref/out_ref: (1, N, k_tile); scale/shift: (1, N, 1) f32.
    out_ref[...] = (y_ref[...].astype(jnp.float32) * scale_ref[...]
                    + shift_ref[...]).astype(out_ref.dtype)


# ----------------------------------------------------------------------------
# Wrapper
# ----------------------------------------------------------------------------
def global_layer_norm(y, gamma, beta, *, force_two_pass=False, force_k_tile=None):
    """y: [M, N, K], gamma/beta: [1, N, 1] -> [M, N, K]."""
    M, N, K = y.shape
    itemsize = jnp.dtype(y.dtype).itemsize
    block_budget, vmem_limit, two_tc = _budgets()

    # Double-buffered in + out blocks at input precision plus one f32 temp.
    per_sample_bytes = N * K * (4 * itemsize + 4)

    if per_sample_bytes <= block_budget and not force_two_pass:
        # ---------------- fused single-pass path ----------------
        tb = max(1, block_budget // per_sample_bytes)
        tb = min(tb, M)
        if two_tc and M >= 2:
            # Keep >= 2 grid steps so both TensorCores get work (v7x only;
            # on single-TC chips this would just add step overhead).
            tb = min(tb, _cdiv(M, 2))
        grid = (_cdiv(M, tb),)

        kernel = functools.partial(_gln_fused_kernel,
                                   inv_count=1.0 / float(N * K))
        return pl.pallas_call(
            kernel,
            out_shape=jax.ShapeDtypeStruct((M, N, K), y.dtype),
            grid_spec=pltpu.PrefetchScalarGridSpec(
                num_scalar_prefetch=0,
                grid=grid,
                in_specs=[
                    pl.BlockSpec((tb, N, K), lambda i: (i, 0, 0)),
                    pl.BlockSpec((1, N, 1), lambda i: (0, 0, 0)),
                    pl.BlockSpec((1, N, 1), lambda i: (0, 0, 0)),
                ],
                out_specs=pl.BlockSpec((tb, N, K), lambda i: (i, 0, 0)),
            ),
            compiler_params=pltpu.CompilerParams(
                dimension_semantics=("parallel",),
                vmem_limit_bytes=vmem_limit,
            ),
            cost_estimate=pl.CostEstimate(
                flops=5 * M * N * K,
                transcendentals=M,
                bytes_accessed=(2 * M * N * K + 2 * N) * itemsize,
            ),
        )(y, gamma, beta)

    # ---------------- K-tiled two-pass path ----------------
    # TODO(synk): pathological channel counts where even (N, 128) exceeds the
    # budget would additionally need N-tiling; not handled here.
    per_col_bytes = N * (4 * itemsize + 4)
    k_tile = max(128, (block_budget // per_col_bytes) // 128 * 128)
    if force_k_tile is not None:
        k_tile = int(force_k_tile)
    k_tile = min(k_tile, _cdiv(K, 128) * 128)
    kt = _cdiv(K, k_tile)

    # Pass 1: per-batch sum / sum-of-squares.
    stats_kernel = functools.partial(_gln_stats_kernel, k_tile=k_tile, true_k=K)
    s, ss = pl.pallas_call(
        stats_kernel,
        out_shape=(jax.ShapeDtypeStruct((M, 1, 1), jnp.float32),
                   jax.ShapeDtypeStruct((M, 1, 1), jnp.float32)),
        grid_spec=pltpu.PrefetchScalarGridSpec(
            num_scalar_prefetch=0,
            grid=(M, kt),
            in_specs=[pl.BlockSpec((1, N, k_tile), lambda m, k: (m, 0, k))],
            out_specs=(pl.BlockSpec((1, 1, 1), lambda m, k: (m, 0, 0)),
                       pl.BlockSpec((1, 1, 1), lambda m, k: (m, 0, 0))),
        ),
        compiler_params=pltpu.CompilerParams(
            dimension_semantics=("parallel", "arbitrary"),
            vmem_limit_bytes=vmem_limit,
        ),
        cost_estimate=pl.CostEstimate(
            flops=3 * M * N * K,
            transcendentals=0,
            bytes_accessed=M * N * K * itemsize,
        ),
    )(y)

    # Tiny per-batch finalize + affine folding in plain JAX (M*N elements).
    inv_count = 1.0 / float(N * K)
    mean = s * inv_count                                     # (M, 1, 1)
    var = jnp.maximum(ss * inv_count - mean * mean, 0.0)
    inv_std = jax.lax.rsqrt(var + EPS)
    scale = gamma.astype(jnp.float32) * inv_std              # (M, N, 1)
    shift = beta.astype(jnp.float32) - mean * scale          # (M, N, 1)

    # Pass 2: normalize in lane-dense (N, k_tile) blocks.
    return pl.pallas_call(
        _gln_norm_kernel,
        out_shape=jax.ShapeDtypeStruct((M, N, K), y.dtype),
        grid_spec=pltpu.PrefetchScalarGridSpec(
            num_scalar_prefetch=0,
            grid=(M, kt),
            in_specs=[
                pl.BlockSpec((1, N, k_tile), lambda m, k: (m, 0, k)),
                pl.BlockSpec((1, N, 1), lambda m, k: (m, 0, 0)),
                pl.BlockSpec((1, N, 1), lambda m, k: (m, 0, 0)),
            ],
            out_specs=pl.BlockSpec((1, N, k_tile), lambda m, k: (m, 0, k)),
        ),
        compiler_params=pltpu.CompilerParams(
            dimension_semantics=("parallel", "parallel"),
            vmem_limit_bytes=vmem_limit,
        ),
        cost_estimate=pl.CostEstimate(
            flops=2 * M * N * K,
            transcendentals=0,
            bytes_accessed=2 * M * N * K * itemsize + 8 * M * N,
        ),
    )(y, scale, shift)


def reference_gln(y, gamma, beta):
    # mirrors the PyTorch forward exactly
    mean = jnp.mean(jnp.mean(y, axis=1, keepdims=True), axis=2, keepdims=True)
    var = jnp.mean(
        jnp.mean((y - mean) ** 2, axis=1, keepdims=True), axis=2, keepdims=True
    )
    return gamma * (y - mean) / jnp.power(var + EPS, 0.5) + beta


if __name__ == "__main__":
    key = jax.random.PRNGKey(0)
    M, N, K = 2, 4, 16  # batch, channel_size, length

    y = jax.random.normal(key, (M, N, K), dtype=jnp.float32)

    # deterministic parameter init, matching reset_parameters(): gamma=1, beta=0
    gamma = jnp.ones((1, N, 1), dtype=jnp.float32)
    beta = jnp.zeros((1, N, 1), dtype=jnp.float32)

    out = jax.block_until_ready(global_layer_norm(y, gamma, beta))
    ref = reference_gln(y, gamma, beta)
    assert out.shape == (M, N, K)
    assert jnp.allclose(out, ref, atol=1e-5, rtol=1e-5), "fused path mismatch"

    # Also exercise the K-tiled two-pass fallback (unaligned K, masked tail).
    M2, N2, K2 = 3, 5, 200
    y2 = jax.random.normal(jax.random.PRNGKey(1), (M2, N2, K2), dtype=jnp.float32)
    gamma2 = jax.random.normal(jax.random.PRNGKey(2), (1, N2, 1), dtype=jnp.float32)
    beta2 = jax.random.normal(jax.random.PRNGKey(3), (1, N2, 1), dtype=jnp.float32)
    out2 = jax.block_until_ready(
        global_layer_norm(y2, gamma2, beta2, force_two_pass=True, force_k_tile=128))
    ref2 = reference_gln(y2, gamma2, beta2)
    assert out2.shape == (M2, N2, K2)
    assert jnp.allclose(out2, ref2, atol=1e-4, rtol=1e-4), "two-pass mismatch"

    print("KERNEL_OK")
</pallas_src>

<mosaic_0001>
module attributes {stable_mosaic.version = 11 : i64} {
  func.func @_gln_fused_kernel(%arg0: i32, %arg1: memref<1x4x16xf32, #tpu.memory_space<vmem>>, %arg2: memref<1x4x1xf32, #tpu.memory_space<vmem>>, %arg3: memref<1x4x1xf32, #tpu.memory_space<vmem>>, %arg4: memref<1x4x16xf32, #tpu.memory_space<vmem>>) attributes {dimension_semantics = [#tpu.dimension_semantics<parallel>], iteration_bounds = array<i64: 2>, scalar_prefetch = 0 : i64, scratch_operands = 0 : i64, tpu.core_type = #tpu.core_type<tc>, window_params = [{transform_indices = @transform_0, window_bounds = array<i64: 1, 4, 16>}, {pipeline_mode = #tpu.pipeline_mode<synchronous>, transform_indices = @transform_1, window_bounds = array<i64: 1, 4, 1>}, {pipeline_mode = #tpu.pipeline_mode<synchronous>, transform_indices = @transform_2, window_bounds = array<i64: 1, 4, 1>}, {transform_indices = @transform_3, window_bounds = array<i64: 1, 4, 16>}]} {
    %c0 = arith.constant 0 : index
    %c0_0 = arith.constant 0 : index
    %c0_1 = arith.constant 0 : index
    %0 = vector.load %arg1[%c0, %c0_0, %c0_1] : memref<1x4x16xf32, #tpu.memory_space<vmem>>, vector<1x4x16xf32>
    %cst = arith.constant dense<0.000000e+00> : vector<1xf32>
    %1 = vector.multi_reduction <add>, %0, %cst [1, 2] : vector<1x4x16xf32> to vector<1xf32>
    %2 = vector.shape_cast %1 : vector<1xf32> to vector<1x1x1xf32>
    %3 = arith.mulf %0, %0 : vector<1x4x16xf32>
    %cst_2 = arith.constant dense<0.000000e+00> : vector<1xf32>
    %4 = vector.multi_reduction <add>, %3, %cst_2 [1, 2] : vector<1x4x16xf32> to vector<1xf32>
    %5 = vector.shape_cast %4 : vector<1xf32> to vector<1x1x1xf32>
    %cst_3 = arith.constant 1.562500e-02 : f32
    %6 = vector.broadcast %cst_3 : f32 to vector<1x1x1xf32>
    %7 = arith.mulf %2, %6 : vector<1x1x1xf32>
    %cst_4 = arith.constant 1.562500e-02 : f32
    %8 = vector.broadcast %cst_4 : f32 to vector<1x1x1xf32>
    %9 = arith.mulf %5, %8 : vector<1x1x1xf32>
    %10 = arith.mulf %7, %7 : vector<1x1x1xf32>
    %11 = arith.subf %9, %10 : vector<1x1x1xf32>
    %cst_5 = arith.constant 0.000000e+00 : f32
    %12 = vector.broadcast %cst_5 : f32 to vector<1x1x1xf32>
    %13 = arith.maximumf %11, %12 : vector<1x1x1xf32>
    %cst_6 = arith.constant 9.99999993E-9 : f32
    %14 = vector.broadcast %cst_6 : f32 to vector<1x1x1xf32>
    %15 = arith.addf %13, %14 : vector<1x1x1xf32>
    %16 = math.rsqrt %15 : vector<1x1x1xf32>
    %c0_7 = arith.constant 0 : index
    %c0_8 = arith.constant 0 : index
    %c0_9 = arith.constant 0 : index
    %17 = vector.load %arg2[%c0_7, %c0_8, %c0_9] : memref<1x4x1xf32, #tpu.memory_space<vmem>>, vector<1x4x1xf32>
    %c0_10 = arith.constant 0 : index
    %c0_11 = arith.constant 0 : index
    %c0_12 = arith.constant 0 : index
    %18 = vector.load %arg3[%c0_10, %c0_11, %c0_12] : memref<1x4x1xf32, #tpu.memory_space<vmem>>, vector<1x4x1xf32>
    %19 = vector.broadcast %16 : vector<1x1x1xf32> to vector<1x4x1xf32>
    %20 = arith.mulf %17, %19 : vector<1x4x1xf32>
    %21 = vector.broadcast %7 : vector<1x1x1xf32> to vector<1x4x1xf32>
    %22 = arith.mulf %21, %20 : vector<1x4x1xf32>
    %23 = arith.subf %18, %22 : vector<1x4x1xf32>
    %c0_13 = arith.constant 0 : index
    %c0_14 = arith.constant 0 : index
    %c0_15 = arith.constant 0 : index
    %24 = vector.load %arg1[%c0_13, %c0_14, %c0_15] : memref<1x4x16xf32, #tpu.memory_space<vmem>>, vector<1x4x16xf32>
    %25 = vector.broadcast %20 : vector<1x4x1xf32> to vector<1x4x16xf32>
    %26 = arith.mulf %24, %25 : vector<1x4x16xf32>
    %27 = vector.broadcast %23 : vector<1x4x1xf32> to vector<1x4x16xf32>
    %28 = arith.addf %26, %27 : vector<1x4x16xf32>
    %c0_16 = arith.constant 0 : index
    %c0_17 = arith.constant 0 : index
    %c0_18 = arith.constant 0 : index
    %29 = vector.load %arg4[%c0_16, %c0_17, %c0_18] : memref<1x4x16xf32, #tpu.memory_space<vmem>>, vector<1x4x16xf32>
    tpu.vector_store %arg4[%c0_16, %c0_17, %c0_18], %28 {strides = array<i32>} : memref<1x4x16xf32, #tpu.memory_space<vmem>>, vector<1x4x16xf32>,
    return
  }
  func.func @transform_0(%arg0: i32) -> (i32, i32, i32) {
    %c0_i32 = arith.constant 0 : i32
    %c0_i32_0 = arith.constant 0 : i32
    %c0_i32_1 = arith.constant 0 : i32
    return %arg0, %c0_i32, %c0_i32_0 : i32, i32, i32
  }
  func.func @transform_1(%arg0: i32) -> (i32, i32, i32) {
    %c0_i32 = arith.constant 0 : i32
    %c0_i32_0 = arith.constant 0 : i32
    %c0_i32_1 = arith.constant 0 : i32
    %c0_i32_2 = arith.constant 0 : i32
    return %c0_i32, %c0_i32_0, %c0_i32_1 : i32, i32, i32
  }
  func.func @transform_2(%arg0: i32) -> (i32, i32, i32) {
    %c0_i32 = arith.constant 0 : i32
    %c0_i32_0 = arith.constant 0 : i32
    %c0_i32_1 = arith.constant 0 : i32
    %c0_i32_2 = arith.constant 0 : i32
    return %c0_i32, %c0_i32_0, %c0_i32_1 : i32, i32, i32
  }
  func.func @transform_3(%arg0: i32) -> (i32, i32, i32) {
    %c0_i32 = arith.constant 0 : i32
    %c0_i32_0 = arith.constant 0 : i32
    %c0_i32_1 = arith.constant 0 : i32
    return %arg0, %c0_i32, %c0_i32_0 : i32, i32, i32
  }
}

</mosaic_0001>

<bundles_post_ra>
// kernel: tpu_custom_call.1
= control target key start
LH: loop header
LB: loop body
LE: loop exit
PB: predicated region body
PF: predicated region fallthrough
CT: control target
= control target key end

     0   :  { %8 = vsyncpa [#allocation3], 0  ;;  %s534_s0 = inlined_call_operand.vmem [shape: f32[2,4,16], index: 0, kind: input, shape index: {}]   ;;  %s535_s1 = inlined_call_operand.vmem [shape: f32[1,4,1], index: 1, kind: input, shape index: {}]   ;;  %s536_s2 = inlined_call_operand.vmem [shape: f32[1,4,1], index: 2, kind: input, shape index: {}]   ;;  %s537_s3 = inlined_call_operand.hbm [shape: f32[2,4,16], index: 3, kind: output, shape index: {}]  }
   0x1   :  { %10 = vsyncpa [#allocation3 + $0x1], 0  ;;  %s425_s12 = smov 0   ;;  %s427_s13 = smov 0  }
   0x2   :  { %s429_s14 = smov 0   ;;  %s431_s15 = smov 0  }
   0x3 LB: > { %s446_s16 = sadd.s32 4294967295, %s401_s15   ;;  %s285_s17 = sadd.s32 4294967294, %s401_s15   ;;  %s401_s15 = sphi %s431_s15, %s543_s15   ;;  %s397_s14 = sphi %s429_s14, %s542_s14   ;;  %s393_s13 = sphi %s427_s13, %s541_s13   ;;  %s389_s12 = sphi %s425_s12, %s540_s12  }
   0x4   : > { %s450_s18 = sadd.s32 1, %s401_s15   ;;  %s91_s19 = sadd.s32 1, %s397_s14 }
   0x5   : > { %s88_s20 = ssub.s32 %s401_s15, %s450_s18  ;;  %p101_p0 = scmp.ne.s32.totalorder %s397_s14, %s393_s13 }
   0x6   : > { %p89_p1 = scmp.eq.s32.totalorder %s88_s20, 0  ;;  %p102_p2 = scmp.eq.s32.totalorder %s446_s16, 1 }
   0x7   : > { %p107_p3 = scmp.ne.s32.totalorder %s393_s13, %s389_s12  ;;  %p108_p4 = scmp.eq.s32.totalorder %s285_s17, 1 }
   0x8   : > { %s461_s21 = scalar_select %p89_p1, %s397_s14, %s91_s19  }
   0x9   : > { %p463_p5 = por %p102_p2, %p101_p0  ;;  %p467_p6 = por %p108_p4, %p107_p3 }
   0xa   : > { %p288_p7 = scmp.ge.s32.totalorder %s401_s15, 1  ;;  %p139_p8 = scmp.lt.s32.totalorder %s401_s15, 3 }
   0xc   : > { %p140_p9 = pnand %p288_p7, %p139_p8 }
   0xd   : > { %p162_p10 = scmp.lt.s32.totalorder (!%p140_p9), %s446_s16, 1  ;;  %vm167_vm0 = vcmask (!%p140_p9), 125952   ;;  %v403_v4 = vmov (!%p140_p9), 0   ;;  %v194_v25 = vld [vmem:[%s535_s1] sm:$0xf] (!%p140_p9)  ;;  %s159_s6 = sand.u32 (!%p140_p9), 1, %s393_s13  }
   0xe   : > { %143 = sbr.rel (%p140_p9) target bundleno = 354 (0x162), region = 32  ;;  %335 = vset.pattern.permute.xlu1 (!%p140_p9), %v403_v4  ;;  %336 = vset.pattern.permute.xlu0 (!%p140_p9), %v403_v4  ;;  %v195_v28 = vld [vmem:[%s536_s2] sm:$0xf] (!%p140_p9)  ;;  %s289_s7 = sshll.u32 (!%p140_p9), %s159_s6, 2 }
   0xf   : > { %s292_s8 = sshll.u32 (!%p140_p9), %s446_s16, 6  ;;  %s161_s9 = scalar_lea.vmem (!%p140_p9), [#allocation2], %s289_s7 }
  0x10   : > { %s226_s10 = sshll.u32 (!%p140_p9), %s161_s9, 4  ;;  %s491_s19 = scalar_lea.hbm (!%p140_p9), %s537_s3, %s292_s8  ;;  %s493_s10 = int_to_ptr.vmem [resolvable:$true] %s226_s10 }
  0x11   : > { %s213_s20 = scalar_lea.sflag (!%p140_p9), [#allocation3], %s159_s6 }
  0x15   : > { %s163_s24 = scalar_select %p162_p10, %s446_s16, 1 }
  0x16   : > { %s404_s16 = smov [#allocation2]  }
  0x17   : > { %s290_s25 = sshll.u32 %s163_s24, 2  ;;  %s339_s24 = scalar_lea.vmem %s493_s10, 64 }
  0x18   : > { %s165_s28 = scalar_lea.vmem %s534_s0, %s290_s25  ;;  %p340_p11 = scmp.ne.s32.totalorder %s493_s10, %s339_s24 }
  0x19   : > { %v166_v0 = vld [vmem:[%s165_s28] sm:$0xf]  ;;  %s343_s25 = sshll.u32 %s404_s16, 4  ;;  %s344_s25 = int_to_ptr.vmem [resolvable:$false] %s343_s25 }
  0x1a   : > { %v168_v1 = vsel %vm167_vm0, %v166_v0, 0.0  ;;  %v177_v2 = vmul.f32 %v166_v0, %v166_v0  ;;  %p341_p12 = pnand %p340_p11, %p463_p5  ;;  %s345_s26 = scalar_lea.vmem %s344_s25, 128 }
  0x1b   : > { %169 = vadd.xlane.f32.xlu0 %v168_v1  ;;  %p346_p0 = scmp.lt.s32.totalorder %s493_s10, %s344_s25  ;;  %p347_p1 = scmp.lt.s32.totalorder %s345_s26, %s339_s24 }
  0x1c   : > { %v178_v3 = vsel %vm167_vm0, %v177_v2, 0.0  ;;  %p342_p13 = pneg %p341_p12 }
  0x1d   : > { %p348_p2 = por %p347_p1, %p346_p0 }
  0x1f   : > { %179 = vadd.xlane.f32.xlu0 %v178_v3  ;;  %p349_p3 = pnand %p348_p2, %p342_p13 }
  0xa8   : > { %v170_v5 = vpop.xlane.xlu0 %169 }
  0xa9   : > { %v171_v6 = vrot.slane %v170_v5, 4 }
  0xab   : > { %v172_v7 = vadd.f32 %v171_v6, %v170_v5 }
  0xac   : > { %v180_v8 = vpop.xlane.xlu0 %179 }
  0xad   : > { %v173_v9 = vrot.slane %v172_v7, 2  ;;  %v181_v10 = vrot.slane %v180_v8, 4 }
  0xaf   : > { %v174_v11 = vadd.f32 %v173_v9, %v172_v7  ;;  %v182_v12 = vadd.f32 %v181_v10, %v180_v8 }
  0xb1   : > { %v175_v13 = vrot.slane %v174_v11, 1  ;;  %v183_v14 = vrot.slane %v182_v12, 2 }
  0xb3   : > { %v176_v15 = vadd.f32 %v175_v13, %v174_v11  ;;  %v184_v16 = vadd.f32 %v183_v14, %v182_v12 }
  0xb5   : > { %v185_v17 = vrot.slane %v184_v16, 1  ;;  %v187_v18 = vmul.f32 0.015625, %v176_v15 }
  0xb7   : > { %v186_v19 = vadd.f32 %v185_v17, %v184_v16  ;;  %v189_v21 = vmul.f32 %v187_v18, %v187_v18 }
  0xb9   : > { %v188_v20 = vmul.f32 0.015625, %v186_v19 }
  0xbb   : > { %v190_v22 = vsub.f32 %v188_v20, %v189_v21 }
  0xbd   : > { %v191_v23 = vmax.f32 %v190_v22, 0.0 }
  0xbf   : > { %v192_v24 = vadd.f32 1e-08, %v191_v23 }
  0xc1   : > { %337 = vrsqrt.f32 %v192_v24 }
  0xcb   : > { %v338_v26 = vpop.eup %337 }
  0xcc   : > { %v196_v27 = vmul.f32 %v338_v26, %v194_v25 }
  0xce   : > { %201 = vperm.xlu1 %335, %v196_v27   ;;  %v197_v29 = vmul.f32 %v196_v27, %v187_v18 }
  0xd0   : > { %v198_v30 = vsub.f32 %v195_v28, %v197_v29 }
  0xd2   : > { %207 = vperm.xlu1 %335, %v198_v30  }
 0x14d   : > { %v202_v31 = vpop.permute.xlu1 %201 }
 0x14e   : > { %v204_v32 = vmul.f32 %v202_v31, %v166_v0 }
 0x151   : > { %v208_v33 = vpop.permute.xlu1 %207 }
 0x152   : > { %v210_v34 = vadd.f32 %v208_v33, %v204_v32 }
 0x154   : > { %211 = vst.msk [vmem:[%s161_s9] sm:$0xf] %vm167_vm0, %v210_v34 }
 0x155   : > { %352 = shalt.err (!%p349_p3)
}
 0x156   : > { %s353_s27 = scalar_lea.hbm %s491_s19, 64  ;;  %s357_s30 = scalar_lea.hbm %s537_s3, 128 }
 0x157   : > { %p354_p4 = scmp.ne.s32.totalorder %s491_s19, %s353_s27  ;;  %p358_p9 = scmp.lt.u32.totalorder %s491_s19, %s537_s3 }
 0x158   : > { %p359_p10 = scmp.lt.u32.totalorder %s357_s30, %s353_s27  ;;  %p361_p12 = scmp.lt.u32.totalorder %s353_s27, %s491_s19 }
 0x159   : > { %p355_p7 = pnand %p354_p4, %p463_p5 }
 0x15a   : > { %p360_p11 = por %p359_p10, %p358_p9 }
 0x15b   : > { %p356_p8 = pneg %p355_p7 }
 0x15c   : > { %p362_p13 = por %p361_p12, %p360_p11 }
 0x15e   : > { %p363_p0 = pnand %p362_p13, %p356_p8 }
 0x160   : > { %366 = shalt.err (!%p363_p0)
}
 0x161   : > { %295 = dma.vmem_to_hbm [thread:$0]  (%p463_p5), %s493_s10, 64, %s491_s19, %s213_s20  }
 0x162 PF: > { %p301_p1 = scmp.ge.s32.totalorder %s401_s15, 2  ;;  %s238_s6 = sand.u32 1, %s389_s12  }
 0x163   : > { %s239_s7 = scalar_lea.sflag [#allocation3], %s238_s6 }
 0x164   : > { %p298_p2 = pnand %p301_p1, %p467_p6 }
 0x166   : > { %384 = dma.done.wait (!%p298_p2), %s239_s7, 64  }
 0x167   : > { %386 = vsyncadd (!%p298_p2), %s239_s7, 4294967232  ;;  %p13_p3 = scmp.ge.s32.totalorder %s450_s18, 4   ;;  %s540_s12 = smov %s393_s13 }
 0x168   : > { %s541_s13 = smov %s397_s14  ;;  %s542_s14 = smov %s461_s21 }
 0x169   : > { %s543_s15 = smov %s450_s18  ;;  %15 = sbr.rel (!%p13_p3) target bundleno = 3 (0x3), region = 67 }
 0x170   :  { %244 = vsyncpa [#allocation3], 1 }
 0x171   :  { %246 = vsyncpa [#allocation3 + $0x1], 1 }

</bundles_post_ra>
